<compile_context>
chip_gen: v7x
topology: tpu7x:2x2x1
jax: 0.10.0
libtpu: 0.0.40
codegen_flags: <defaults>
</compile_context>

<pallas_src>
import functools
import math

import numpy as np

import jax
import jax.numpy as jnp
from jax.experimental import pallas as pl
from jax.experimental.pallas import tpu as pltpu


def _pe_kernel(s_ref, phase_ref, x_ref, o_ref):
    """Encode one packed-row tile.

    x_ref:     (tile_rows, k*dim)      k samples packed per row
    s_ref:     (k*dim, k*out_dim)      block-diagonal scaled selection matrix (resident)
    phase_ref: (1, k*out_dim)          pi/2 on cos slots, 0 on sin slots (resident)
    o_ref:     (tile_rows, k*out_dim)  encoded output (lane width multiple of 128)
    """
    x = x_ref[...].astype(jnp.float32)
    # Replicate + frequency-scale on the idle MXU: theta[r, j*out_dim + q*dim + d]
    # = 2*pi*2^(q//2) * x[r, j*dim + d].  HIGHEST precision keeps f32 accuracy.
    theta = jnp.dot(x, s_ref[...],
                    preferred_element_type=jnp.float32,
                    precision=jax.lax.Precision.HIGHEST)
    # cos(t) = sin(t + pi/2): one EUP pass over the whole slab, no select.
    o_ref[...] = jnp.sin(theta + phase_ref[...]).astype(o_ref.dtype)


@functools.lru_cache(maxsize=None)
def _make_tables(num_octaves: int, dim: int, k: int):
    """Block-diagonal scaled selection matrix S and per-output-column phase row."""
    out_dim = 2 * num_octaves * dim
    s = np.zeros((k * dim, k * out_dim), np.float32)
    phase = np.zeros((1, k * out_dim), np.float32)
    half_pi = np.float32(0.5 * math.pi)
    for j in range(k):
        for i in range(num_octaves):
            freq = np.float32(2.0 * math.pi * (2.0 ** i))
            for d in range(dim):
                row = j * dim + d
                ccol = j * out_dim + 2 * i * dim + d        # cos slot
                scol = ccol + dim                           # sin slot
                s[row, ccol] = freq
                s[row, scol] = freq
                phase[0, ccol] = half_pi
    return s, phase


def positional_encoding(samples: jax.Array, num_octaves: int, *, tile_rows=None) -> jax.Array:
    """Pallas equivalent of PositionalEncoding(num_octaves)(samples)."""
    *batch, dim = samples.shape
    n = 1
    for b in batch:
        n *= b
    out_dim = num_octaves * 2 * dim
    dtype = samples.dtype
    itemsize = jnp.dtype(dtype).itemsize
    sub = {4: 8, 2: 16, 1: 32}.get(itemsize, 8)     # sublane multiple for this dtype

    # ---- lane-dense packing: k samples per packed row so k*out_dim % 128 == 0
    k = 128 // math.gcd(out_dim, 128)
    in_w = k * dim
    out_w = k * out_dim

    x2d = samples.reshape(n, dim)
    n_pad = ((n + k - 1) // k) * k
    if n_pad != n:
        # TODO(synk): the <k-row pad + the post-kernel [:n] slice (one output copy)
        # could be removed with a separate ragged-tail output; only taken when n % k != 0.
        x2d = jnp.pad(x2d, ((0, n_pad - n), (0, 0)))
    rows = n_pad // k
    xp = x2d.reshape(rows, in_w)                    # row-major view of the same bytes

    s_np, phase_np = _make_tables(num_octaves, dim, k)
    s = jnp.asarray(s_np)
    phase = jnp.asarray(phase_np)

    # ---- row-tile selection (lane-padded VMEM accounting) --------------------
    if tile_rows is None:
        in_w_pad = ((in_w + 127) // 128) * 128      # input block pads to 128 lanes in VMEM
        bytes_per_row = (2 * itemsize * in_w_pad    # double-buffered input block
                         + 2 * itemsize * out_w     # double-buffered output block
                         + 4 * 4 * out_w)           # ~4 live f32 compute slabs
        budget = 16 * 1024 * 1024
        tile_rows = max(sub, min(4096, (budget // bytes_per_row) // sub * sub))
    # v7x (2 TensorCores): keep >=2 grid steps only when each half is still big;
    # on smaller problems (and single-TC v5e/v6e) keep the large tile.
    if rows >= 2048 and tile_rows > pl.cdiv(rows, 2):
        tile_rows = pl.cdiv(rows, 2)
    if tile_rows >= rows:
        tile_rows = rows                            # single full-extent block
    else:
        tile_rows = max(sub, (tile_rows // sub) * sub)

    n_tiles = pl.cdiv(rows, tile_rows)              # final partial block is clamped by Pallas

    cost = pl.CostEstimate(
        flops=2 * rows * in_w * out_w + rows * out_w,
        transcendentals=rows * out_w,
        bytes_accessed=itemsize * rows * (in_w + out_w) + 4 * (in_w * out_w + out_w),
    )

    out_packed = pl.pallas_call(
        _pe_kernel,
        out_shape=jax.ShapeDtypeStruct((rows, out_w), dtype),
        grid_spec=pltpu.PrefetchScalarGridSpec(
            num_scalar_prefetch=0,
            grid=(n_tiles,),
            in_specs=[
                pl.BlockSpec((k * dim, out_w), lambda i: (0, 0)),    # S (resident)
                pl.BlockSpec((1, out_w), lambda i: (0, 0)),          # phase row (resident)
                pl.BlockSpec((tile_rows, in_w), lambda i: (i, 0)),   # packed samples
            ],
            out_specs=pl.BlockSpec((tile_rows, out_w), lambda i: (i, 0)),
        ),
        compiler_params=pltpu.CompilerParams(
            dimension_semantics=("parallel",),
            vmem_limit_bytes=40 * 1024 * 1024,
        ),
        cost_estimate=cost,
    )(s, phase, xp)

    out2d = out_packed.reshape(n_pad, out_dim)
    if n_pad != n:
        out2d = out2d[:n]
    return out2d.reshape(*batch, out_dim)


def positional_encoding_ref(samples: jax.Array, num_octaves: int) -> jax.Array:
    """Pure-JAX reference matching the PyTorch module."""
    parts = []
    for i in range(num_octaves):
        parts.append(jnp.cos(2.0 * math.pi * (2 ** i) * samples))
        parts.append(jnp.sin(2.0 * math.pi * (2 ** i) * samples))
    return jnp.concatenate(parts, axis=-1)


if __name__ == "__main__":
    key = jax.random.PRNGKey(0)

    # Case 1: *batch = (2, 64), dim = 3 -> n = 128, a multiple of k=16: zero-copy packing path.
    num_octaves = 4
    samples = jax.random.uniform(key, (2, 64, 3), dtype=jnp.float32)
    out = jax.block_until_ready(positional_encoding(samples, num_octaves))
    ref = positional_encoding_ref(samples, num_octaves)
    assert out.shape == (2, 64, num_octaves * 2 * 3), out.shape
    err = float(jnp.max(jnp.abs(out - ref)))
    assert jnp.allclose(out, ref, atol=1e-4, rtol=1e-5), err

    # Case 2: n = 3000 (not a multiple of k=64) exercises the pack-pad / slice path.
    num_octaves2 = 3
    samples2 = jax.random.uniform(jax.random.PRNGKey(1), (3, 1000, 3), dtype=jnp.float32)
    out2 = jax.block_until_ready(positional_encoding(samples2, num_octaves2))
    ref2 = positional_encoding_ref(samples2, num_octaves2)
    assert out2.shape == (3, 1000, num_octaves2 * 2 * 3), out2.shape
    err2 = float(jnp.max(jnp.abs(out2 - ref2)))
    assert jnp.allclose(out2, ref2, atol=1e-4, rtol=1e-5), err2

    print("KERNEL_OK")
</pallas_src>

<mosaic_0001>
module attributes {stable_mosaic.version = 11 : i64} {
  func.func @_pe_kernel(%arg0: i32, %arg1: memref<48x384xf32, #tpu.memory_space<vmem>>, %arg2: memref<1x384xf32, #tpu.memory_space<vmem>>, %arg3: memref<8x48xf32, #tpu.memory_space<vmem>>, %arg4: memref<8x384xf32, #tpu.memory_space<vmem>>) attributes {dimension_semantics = [#tpu.dimension_semantics<parallel>], iteration_bounds = array<i64: 1>, scalar_prefetch = 0 : i64, scratch_operands = 0 : i64, tpu.core_type = #tpu.core_type<tc>, window_params = [{pipeline_mode = #tpu.pipeline_mode<synchronous>, transform_indices = @transform_0, window_bounds = array<i64: 48, 384>}, {pipeline_mode = #tpu.pipeline_mode<synchronous>, transform_indices = @transform_1, window_bounds = array<i64: 1, 384>}, {transform_indices = @transform_2, window_bounds = array<i64: 8, 48>}, {transform_indices = @transform_3, window_bounds = array<i64: 8, 384>}]} {
    %c0 = arith.constant 0 : index
    %c0_0 = arith.constant 0 : index
    %0 = vector.load %arg3[%c0, %c0_0] : memref<8x48xf32, #tpu.memory_space<vmem>>, vector<8x48xf32>
    %c0_1 = arith.constant 0 : index
    %c0_2 = arith.constant 0 : index
    %1 = vector.load %arg1[%c0_1, %c0_2] : memref<48x384xf32, #tpu.memory_space<vmem>>, vector<48x384xf32>
    %cst = arith.constant dense<0.000000e+00> : vector<8x384xf32>
    %2 = tpu.matmul %0, %1, %cst {dimension_numbers = #tpu.dot_dimension_numbers<[1], [0], [0], [1], [0, 0, 1, 1], [], []>, precision = #tpu.contract_precision<fp32>} : vector<8x48xf32>, vector<48x384xf32>, vector<8x384xf32> -> vector<8x384xf32>
    %c0_3 = arith.constant 0 : index
    %c0_4 = arith.constant 0 : index
    %3 = vector.load %arg2[%c0_3, %c0_4] : memref<1x384xf32, #tpu.memory_space<vmem>>, vector<1x384xf32>
    %4 = vector.broadcast %3 : vector<1x384xf32> to vector<8x384xf32>
    %5 = arith.addf %2, %4 : vector<8x384xf32>
    %6 = math.sin %5 : vector<8x384xf32>
    %c0_5 = arith.constant 0 : index
    %c0_6 = arith.constant 0 : index
    %7 = vector.load %arg4[%c0_5, %c0_6] : memref<8x384xf32, #tpu.memory_space<vmem>>, vector<8x384xf32>
    tpu.vector_store %arg4[%c0_5, %c0_6], %6 {strides = array<i32>} : memref<8x384xf32, #tpu.memory_space<vmem>>, vector<8x384xf32>,
    return
  }
  func.func @transform_0(%arg0: i32) -> (i32, i32) {
    %c0_i32 = arith.constant 0 : i32
    %c0_i32_0 = arith.constant 0 : i32
    %c0_i32_1 = arith.constant 0 : i32
    return %c0_i32, %c0_i32_0 : i32, i32
  }
  func.func @transform_1(%arg0: i32) -> (i32, i32) {
    %c0_i32 = arith.constant 0 : i32
    %c0_i32_0 = arith.constant 0 : i32
    %c0_i32_1 = arith.constant 0 : i32
    return %c0_i32, %c0_i32_0 : i32, i32
  }
  func.func @transform_2(%arg0: i32) -> (i32, i32) {
    %c0_i32 = arith.constant 0 : i32
    %c0_i32_0 = arith.constant 0 : i32
    return %arg0, %c0_i32 : i32, i32
  }
  func.func @transform_3(%arg0: i32) -> (i32, i32) {
    %c0_i32 = arith.constant 0 : i32
    %c0_i32_0 = arith.constant 0 : i32
    return %arg0, %c0_i32 : i32, i32
  }
}

</mosaic_0001>

<bundles_post_ra>
// kernel: tpu_custom_call.1
= control target key start
LH: loop header
LB: loop body
LE: loop exit
PB: predicated region body
PF: predicated region fallthrough
CT: control target
= control target key end

     0   :  { %8 = vsyncpa [#allocation3], 0  ;;  %s2450_s0 = inlined_call_operand.hbm [shape: f32[48,384], index: 0, kind: input, shape index: {}]   ;;  %s2451_s1 = inlined_call_operand.vmem [shape: f32[1,384], index: 1, kind: input, shape index: {}]   ;;  %s2452_s2 = inlined_call_operand.hbm [shape: f32[8,48], index: 2, kind: input, shape index: {}]   ;;  %s2453_s3 = inlined_call_operand.hbm [shape: f32[8,384], index: 3, kind: output, shape index: {}]  }
   0x1   :  { %9 = vsyncpa [#allocation6], 0 }
   0x2   :  { %10 = vsyncpa [#allocation4], 0  ;;  %s1921_s12 = smov [#allocation2]   ;;  %s1849_s16 = scalar_lea.hbm %s2450_s0, 2304 }
   0x3   :  { %s16_s13 = sshll.u32 %s1921_s12, 4  ;;  %p1850_p0 = scmp.ne.s32.totalorder %s2450_s0, %s1849_s16  ;;  %s17_s13 = int_to_ptr.vmem [resolvable:$true] %s16_s13 }
   0x4   :  { %p1853_p1 = scmp.lt.u32.totalorder %s1849_s16, %s2450_s0 }
   0x6   :  { %p1855_p2 = pnand %p1853_p1, %p1850_p0 }
   0x8   :  { %1858 = shalt.err (!%p1855_p2)
}
   0x9   :  { %s1859_s21 = scalar_lea.vmem %s17_s13, 2304  ;;  %p1864_p4 = scmp.lt.s32.totalorder %s17_s13, %s17_s13 }
   0xa   :  { %p1860_p3 = scmp.ne.s32.totalorder %s17_s13, %s1859_s21  ;;  %p1865_p5 = scmp.lt.s32.totalorder %s1859_s21, %s1859_s21 }
   0xc   :  { %p1866_p6 = por %p1865_p5, %p1864_p4 }
   0xe   :  { %p1867_p7 = pnand %p1866_p6, %p1860_p3 }
  0x10   :  { %1870 = shalt.err (!%p1867_p7)
}
  0x11   :  { %s1922_s22 = smov 384   ;;  %s1923_s23 = smov 24  }
  0x12   :  { %22 = dma.hbm_to_vmem [thread:$0]  %s2450_s0, 2304, %s17_s13, [#allocation3], %s1922_s22, %s1922_s22, %s1923_s23  }
  0x13   :  { %s1924_s26 = smov [#allocation5]   ;;  %s1871_s30 = scalar_lea.hbm %s2452_s2, 128 }
  0x14   :  { %s31_s27 = sshll.u32 %s1924_s26, 4  ;;  %p1872_p8 = scmp.ne.s32.totalorder %s2452_s2, %s1871_s30  ;;  %s32_s27 = int_to_ptr.vmem [resolvable:$true] %s31_s27 }
  0x15   :  { %p1875_p9 = scmp.lt.u32.totalorder %s1871_s30, %s2452_s2 }
  0x17   :  { %p1877_p10 = pnand %p1875_p9, %p1872_p8 }
  0x19   :  { %1880 = shalt.err (!%p1877_p10)
}
  0x1a   :  { %s1881_s8 = scalar_lea.vmem %s32_s27, 128  ;;  %p1886_p12 = scmp.lt.s32.totalorder %s32_s27, %s32_s27 }
  0x1b   :  { %p1882_p11 = scmp.ne.s32.totalorder %s32_s27, %s1881_s8  ;;  %p1887_p13 = scmp.lt.s32.totalorder %s1881_s8, %s1881_s8 }
  0x1d   :  { %p1888_p0 = por %p1887_p13, %p1886_p12 }
  0x1f   :  { %p1889_p1 = pnand %p1888_p0, %p1882_p11 }
  0x21   :  { %1892 = shalt.err (!%p1889_p1)
}
  0x22   :  { %34 = dma.hbm_to_vmem [thread:$0]  %s2452_s2, 128, %s32_s27, [#allocation6]  }
  0x23   :  { %1915 = dma.done.wait [#allocation3], 2304  }
  0x24   :  { %1916 = vsyncadd [#allocation3], 4294964992 }
  0x25   :  { %1917 = dma.done.wait [#allocation6], 128  }
  0x26   :  { %1918 = vsyncadd [#allocation6], 4294967168  ;;  %v1925_v0 = vmov 0.0|0.0   ;;  %vm1926_vm0 = vmmov 0   ;;  %v1927_v1 = vmov 0.0   ;;  %v43_v2 = vld [vmem:[#allocation2 + $0x8] sm:$0xff] }
  0x27   :  { %1734 = vmatprep.subr.bf16.mxu1 %v1925_v0  ;;  %1584 = vmatprep.mubr.msk.f32.mxu1 %vm1926_vm0, %v1927_v1  ;;  %v46_v3 = vld [vmem:[#allocation2 + $0x20] sm:$0xff]  ;;  %v44_v4 = vld [vmem:[#allocation2 + $0x10] sm:$0xff]  ;;  %v81_v5 = vand.u32 4294901760, %v43_v2  ;;  %v47_v7 = vld [vmem:[#allocation2 + $0x28] sm:$0xff]  ;;  %vm77_vm1 = vcmask 392192  }
  0x28   :  { %157 = vmatprep.mubr.f32.mxu0 %v1927_v1  ;;  %v85_v6 = vand.u32 4294901760, %v46_v3  ;;  %v677_v8 = vand.u32 4294901760, %v44_v4  ;;  %v42_v9 = vld [vmem:[#allocation2] sm:$0xff]  ;;  %v45_v10 = vld [vmem:[#allocation2 + $0x18] sm:$0xff]  ;;  %v680_v11 = vand.u32 4294901760, %v47_v7  ;;  %v52_v15 = vld [vmem:[#allocation2 + $0x50] sm:$0xff] }
  0x29   :  { %v83_v12 = vand.u32 4294901760, %v42_v9  ;;  %v87_v13 = vand.u32 4294901760, %v45_v10  ;;  %v49_v14 = vld [vmem:[#allocation2 + $0x38] sm:$0xff]  ;;  %v50_v16 = vld [vmem:[#allocation2 + $0x40] sm:$0xff]  ;;  %v1985_v18 = vsub.f32 %v43_v2, %v81_v5  ;;  %v48_v22 = vld [vmem:[#allocation2 + $0x30] sm:$0xff]  ;;  %v93_v31 = vand.u32 4294901760, %v52_v15 }
  0x2a   :  { %v1983_v17 = vpack.c.bf16 %v85_v6, %v81_v5  ;;  %v1987_v19 = vsub.f32 %v46_v3, %v85_v6  ;;  %v1989_v20 = vsub.f32 %v44_v4, %v677_v8  ;;  %v53_v21 = vld [vmem:[#allocation2 + $0x58] sm:$0xff]  ;;  %v51_v23 = vld [vmem:[#allocation2 + $0x48] sm:$0xff]  ;;  %v1991_v24 = vpack.c.bf16 %v680_v11, %v677_v8  ;;  %v58_v36 = vld [vmem:[#allocation2 + $0x80] sm:$0xff] }
  0x2b   :  { %v1993_v25 = vsub.f32 %v47_v7, %v680_v11  ;;  %v1995_v26 = vpack.c.bf16 %v87_v13, %v83_v12  ;;  %v1997_v27 = vsub.f32 %v42_v9, %v83_v12  ;;  %v55_v28 = vld [vmem:[#allocation2 + $0x68] sm:$0xff]  ;;  %v2000_v29 = vsub.f32 %v45_v10, %v87_v13  ;;  %v56_v38 = vld [vmem:[#allocation2 + $0x70] sm:$0xff]  ;;  %v54_v44 = vld [vmem:[#allocation2 + $0x60] sm:$0xff] }
  0x2c   :  { %1663 = vmatprep.subr.bf16.mxu0 %v1983_v17  ;;  %v89_v30 = vand.u32 4294901760, %v49_v14  ;;  %v683_v32 = vand.u32 4294901760, %v50_v16  ;;  %1736 = vmatpush3.bf16.msra.mxu1 %v1991_v24  ;;  %v686_v33 = vand.u32 4294901760, %v53_v21  ;;  %v91_v34 = vand.u32 4294901760, %v48_v22  ;;  %v59_v43 = vld [vmem:[#allocation2 + $0x88] sm:$0xff]  ;;  %v57_v45 = vld [vmem:[#allocation2 + $0x78] sm:$0xff] }
  0x2d   :  { %1665 = vmatpush1.bf16.msra.mxu0 %v1995_v26  ;;  %v95_v35 = vand.u32 4294901760, %v51_v23  ;;  %v97_v37 = vand.u32 4294901760, %v55_v28  ;;  %1737 = vmatprep.subr.bf16.mxu1 %v1925_v0  ;;  %v2009_v41 = vsub.f32 %v52_v15, %v93_v31  ;;  %v101_v51 = vand.u32 4294901760, %v58_v36  ;;  %v41_v58 = vld [vmem:[#allocation5] sm:$0xff] }
  0x2e   :  { %v2005_v39 = vpack.c.bf16 %v93_v31, %v89_v30  ;;  %v2007_v40 = vsub.f32 %v49_v14, %v89_v30  ;;  %v2011_v42 = vsub.f32 %v50_v16, %v683_v32  ;;  %v2013_v46 = vpack.c.bf16 %v686_v33, %v683_v32 }
  0x2f   :  { %v2015_v47 = vsub.f32 %v53_v21, %v686_v33  ;;  %v2017_v48 = vpack.c.bf16 %v95_v35, %v91_v34  ;;  %v2019_v49 = vsub.f32 %v48_v22, %v91_v34  ;;  %v2022_v50 = vsub.f32 %v51_v23, %v95_v35 }
  0x30   :  { %1667 = vmatprep.subr.bf16.mxu0 %v2005_v39  ;;  %v2024_v52 = vsub.f32 %v55_v28, %v97_v37  ;;  %v689_v53 = vand.u32 4294901760, %v56_v38  ;;  %1739 = vmatpush3.bf16.msra.mxu1 %v2013_v46  ;;  %v692_v54 = vand.u32 4294901760, %v59_v43  ;;  %v99_v55 = vand.u32 4294901760, %v54_v44 }
  0x31   :  { %1669 = vmatpush1.bf16.msra.mxu0 %v2017_v48  ;;  %v103_v56 = vand.u32 4294901760, %v57_v45  ;;  %v171_v57 = vand.u32 4294901760, %v1985_v18  ;;  %1740 = vmatprep.subr.bf16.mxu1 %v1925_v0  ;;  %v2030_v59 = vpack.c.bf16 %v101_v51, %v97_v37  ;;  %v2032_v60 = vsub.f32 %v58_v36, %v101_v51 }
  0x32   :  { %v2034_v61 = vsub.f32 %v56_v38, %v689_v53  ;;  %v183_v62 = vand.u32 4294901760, %v1987_v19  ;;  %v2037_v63 = vpack.c.bf16 %v692_v54, %v689_v53  ;;  %v2039_v2 = vsub.f32 %v59_v43, %v692_v54 }
  0x33   :  { %v2041_v3 = vpack.c.bf16 %v103_v56, %v99_v55  ;;  %v2043_v4 = vsub.f32 %v54_v44, %v99_v55  ;;  %1671 = vmatprep.subr.bf16.mxu0 %v2030_v59  ;;  %v2046_v5 = vsub.f32 %v57_v45, %v103_v56  ;;  %v172_v6 = vsub.f32 %v1985_v18, %v171_v57 }
  0x34   :  { %v184_v7 = vsub.f32 %v1987_v19, %v183_v62  ;;  %v79_v8 = vsel %vm77_vm1, %v41_v58, 0  ;;  %1742 = vmatpush3.bf16.msra.mxu1 %v2037_v63  ;;  %v760_v10 = vand.u32 4294901760, %v1989_v20  ;;  %v767_v11 = vand.u32 4294901760, %v1993_v25 }
  0x35   :  { %1673 = vmatpush1.bf16.msra.mxu0 %v2041_v3  ;;  %v2057_v9 = vand.u32 4294901760, %v79_v8  ;;  %v177_v12 = vand.u32 4294901760, %v1997_v27  ;;  %1743 = vmatprep.subr.bf16.mxu1 %v1925_v0  ;;  %v173_v13 = vand.u32 4294901760, %v172_v6  ;;  %v189_v15 = vand.u32 4294901760, %v2000_v29 }
  0x36   :  { %v185_v14 = vand.u32 4294901760, %v184_v7  ;;  %v195_v16 = vand.u32 4294901760, %v2007_v40  ;;  %v761_v22 = vsub.f32 %v1989_v20, %v760_v10  ;;  %v768_v23 = vsub.f32 %v1993_v25, %v767_v11 }
  0x37   :  { %v2066_v21 = vsub.f32 %v79_v8, %v2057_v9  ;;  %v178_v28 = vsub.f32 %v1997_v27, %v177_v12  ;;  %v190_v31 = vsub.f32 %v2000_v29, %v189_v15  ;;  %v207_v33 = vand.u32 4294901760, %v2009_v41 }
  0x38   :  { %v1674_v30 = vpack.c.bf16 %v185_v14, %v173_v13  ;;  %v196_v32 = vsub.f32 %v2007_v40, %v195_v16  ;;  %v762_v35 = vand.u32 4294901760, %v761_v22  ;;  %v769_v36 = vand.u32 4294901760, %v768_v23 }
  0x39   :  { %v2085_v34 = vand.u32 4294901760, %v2066_v21  ;;  %v179_v37 = vand.u32 4294901760, %v178_v28  ;;  %v191_v38 = vand.u32 4294901760, %v190_v31  ;;  %v208_v44 = vsub.f32 %v2009_v41, %v207_v33 }
  0x3a   :  { %1675 = vmatprep.subr.bf16.mxu0 %v1674_v30  ;;  %v197_v43 = vand.u32 4294901760, %v196_v32  ;;  %v774_v45 = vand.u32 4294901760, %v2011_v42  ;;  %v1744_v53 = vpack.c.bf16 %v769_v36, %v762_v35  ;;  %v781_v54 = vand.u32 4294901760, %v2015_v47 }
  0x3b   :  { %v161_v51 = vsub.f32 %v2066_v21, %v2085_v34  ;;  %v201_v55 = vand.u32 4294901760, %v2019_v49  ;;  %v1676_v56 = vpack.c.bf16 %v191_v38, %v179_v37  ;;  %v209_v58 = vand.u32 4294901760, %v208_v44 }
  0x3c   :  { %v775_v6 = vsub.f32 %v2011_v42, %v774_v45  ;;  %v213_v7 = vand.u32 4294901760, %v2022_v50  ;;  %v782_v13 = vsub.f32 %v2015_v47, %v781_v54  ;;  %v219_v22 = vand.u32 4294901760, %v2024_v52 }
  0x3d   :  { %v162_v8 = vand.u32 4294901760, %v161_v51  ;;  %v202_v14 = vsub.f32 %v2019_v49, %v201_v55  ;;  %v1678_v23 = vpack.c.bf16 %v209_v58, %v197_v43  ;;  %v231_v31 = vand.u32 4294901760, %v2032_v60 }
  0x3e   :  { %v776_v28 = vand.u32 4294901760, %v775_v6  ;;  %v214_v30 = vsub.f32 %v2022_v50, %v213_v7  ;;  %v783_v32 = vand.u32 4294901760, %v782_v13  ;;  %v220_v36 = vsub.f32 %v2024_v52, %v219_v22 }
  0x3f   :  { %1585 = vmatmul.mubr.f32.vlgmr.msra.gmra.mrb[0].mxu1 %v162_v8  ;;  %163 = vmatmul.mubr.f32.vlgmr.msra.gmra.mrb[0].mxu0 %v162_v8  ;;  %v203_v35 = vand.u32 4294901760, %v202_v14  ;;  %v788_v37 = vand.u32 4294901760, %v2034_v61  ;;  %v232_v43 = vsub.f32 %v2032_v60, %v231_v31  ;;  %v2455_v44 = vand.u32 4294901760, %v2039_v2 }
  0x40   :  { %1745 = vmatpush3.bf16.msra.mxu1 %v1744_v53  ;;  %1677 = vmatpush1.bf16.msra.mxu0 %v1676_v56  ;;  %v215_v38 = vand.u32 4294901760, %v214_v30  ;;  %v2454_v51 = vand.u32 4294901760, %v2043_v4  ;;  %v1747_v58 = vpack.c.bf16 %v783_v32, %v776_v28  ;;  %v221_v6 = vand.u32 4294901760, %v220_v36 }
  0x41   :  { %1746 = vmatprep.subr.bf16.mxu1 %v1925_v0  ;;  %1679 = vmatprep.subr.bf16.mxu0 %v1678_v23  ;;  %v789_v8 = vsub.f32 %v2034_v61, %v788_v37  ;;  %v237_v53 = vand.u32 4294901760, %v2046_v5  ;;  %v233_v13 = vand.u32 4294901760, %v232_v43  ;;  %v796_v14 = vsub.f32 %v2039_v2, %v2455_v44 }
  0x42   :  { %v1680_v56 = vpack.c.bf16 %v215_v38, %v203_v35  ;;  %v226_v30 = vsub.f32 %v2043_v4, %v2454_v51  ;;  %1599 = vmatprep.mubr.msk.f32.mxu1 %vm1926_vm0, %v1927_v1  ;;  %293 = vmatprep.mubr.f32.mxu0 %v1927_v1  ;;  %v1686_v51 = vpack.c.bf16 %v1987_v19, %v1985_v18 }
  0x43   :  { %v790_v23 = vand.u32 4294901760, %v789_v8  ;;  %v238_v28 = vsub.f32 %v2046_v5, %v237_v53  ;;  %v1682_v32 = vpack.c.bf16 %v233_v13, %v221_v6  ;;  %v797_v35 = vand.u32 4294901760, %v796_v14 }
  0x44   :  { %1748 = vmatpush3.bf16.msra.mxu1 %v1747_v58  ;;  %1681 = vmatpush1.bf16.msra.mxu0 %v1680_v56  ;;  %v227_v36 = vand.u32 4294901760, %v226_v30  ;;  %v1753_v8 = vpack.c.bf16 %v1993_v25, %v1989_v20  ;;  %v1688_v58 = vpack.c.bf16 %v2000_v29, %v1997_v27  ;;  %v1690_v6 = vpack.c.bf16 %v2009_v41, %v2007_v40 }
  0x45   :  { %1749 = vmatprep.subr.bf16.mxu1 %v1925_v0  ;;  %v239_v38 = vand.u32 4294901760, %v238_v28  ;;  %1683 = vmatprep.subr.bf16.mxu0 %v1682_v32  ;;  %v1750_v43 = vpack.c.bf16 %v797_v35, %v790_v23  ;;  %v1756_v56 = vpack.c.bf16 %v2015_v47, %v2011_v42  ;;  %v1759_v13 = vpack.c.bf16 %v2039_v2, %v2034_v61 }
  0x46   :  { %v1696_v14 = vpack.c.bf16 %v2046_v5, %v2043_v4  ;;  %v1771_v30 = vpack.c.bf16 %v767_v11, %v760_v10  ;;  %v1712_v23 = vpack.c.bf16 %v189_v15, %v177_v12  ;;  %v1714_v18 = vpack.c.bf16 %v207_v33, %v195_v16 }
  0x47   :  { %v1684_v44 = vpack.c.bf16 %v239_v38, %v227_v36  ;;  %v1774_v19 = vpack.c.bf16 %v781_v54, %v774_v45  ;;  %v1716_v20 = vpack.c.bf16 %v213_v7, %v201_v55  ;;  %v1718_v25 = vpack.c.bf16 %v231_v31, %v219_v22 }
  0x48   :  { %1751 = vmatpush3.bf16.msra.mxu1 %v1750_v43  ;;  %v2456_v27 = vand.u32 4294901760, %v2039_v2  ;;  %v2457_v40 = vand.u32 4294901760, %v2043_v4  ;;  %v1928_v36 = vmov 683565275  }
  0x49   :  { %1685 = vmatpush1.bf16.msra.mxu0 %v1684_v44  ;;  %1752 = vmatprep.subr.bf16.mxu1 %v1925_v0  ;;  %v1692_v44 = vpack.c.bf16 %v2022_v50, %v2019_v49 }
  0x4a   :  { %1687 = vmatprep.subr.bf16.mxu0 %v1686_v51  ;;  %v1694_v51 = vpack.c.bf16 %v2032_v60, %v2024_v52  ;;  %v1777_v29 = vpack.c.bf16 %v2456_v27, %v788_v37  ;;  %v1720_v41 = vpack.c.bf16 %v237_v53, %v2457_v40 }
  0x4b   :  { %1600 = vmatmul.mubr.f32.vlgmr.msra.gmra.mrb[0].mxu1 %v2057_v9 }
  0x4c   :  { %1754 = vmatpush3.bf16.msra.mxu1 %v1753_v8  ;;  %295 = vmatmul.mubr.f32.vlgmr.msra.gmra.mrb[0].mxu0 %v2057_v9 }
  0x4d   :  { %1689 = vmatpush1.bf16.msra.mxu0 %v1688_v58  ;;  %1755 = vmatprep.subr.bf16.mxu1 %v1925_v0  ;;  %v1929_v58 = vmov 2475754826  }
  0x4e   :  { %1691 = vmatprep.subr.bf16.mxu0 %v1690_v6  ;;  %1614 = vmatprep.mubr.msk.f32.mxu1 %vm1926_vm0, %v1927_v1 }
  0x4f   :  { %389 = vmatprep.mubr.f32.mxu0 %v1927_v1 }
  0x50   :  { %1757 = vmatpush3.bf16.msra.mxu1 %v1756_v56  ;;  %v1930_v56 = vmov 2131351028  }
  0x51   :  { %1693 = vmatpush1.bf16.msra.mxu0 %v1692_v44  ;;  %1758 = vmatprep.subr.bf16.mxu1 %v1925_v0 }
  0x52   :  { %1695 = vmatprep.subr.bf16.mxu0 %v1694_v51  ;;  %v1931_v51 = vmov 2102212464  }
  0x54   :  { %1760 = vmatpush3.bf16.msra.mxu1 %v1759_v13 }
  0x55   :  { %1697 = vmatpush1.bf16.msra.mxu0 %v1696_v14  ;;  %1761 = vmatprep.subr.bf16.mxu1 %v1925_v0  ;;  %v1932_v14 = vmov 920167782  }
  0x56   :  { %1699 = vmatprep.subr.bf16.mxu0 %v1983_v17 }
  0x57   :  { %1615 = vmatmul.mubr.f32.vlgmr.msra.gmra.mrb[0].mxu1 %v2066_v21 }
  0x58   :  { %1763 = vmatpush3.bf16.msra.mxu1 %v1991_v24  ;;  %392 = vmatmul.mubr.f32.vlgmr.msra.gmra.mrb[0].mxu0 %v2066_v21  ;;  %v1710_v21 = vpack.c.bf16 %v183_v62, %v171_v57 }
  0x59   :  { %1701 = vmatpush1.bf16.msra.mxu0 %v1995_v26  ;;  %1764 = vmatprep.subr.bf16.mxu1 %v1925_v0 }
  0x5a   :  { %1703 = vmatprep.subr.bf16.mxu0 %v2005_v39  ;;  %1629 = vmatprep.mubr.msk.f32.mxu1 %vm1926_vm0, %v1927_v1 }
  0x5b   :  { %474 = vmatprep.mubr.f32.mxu0 %v1927_v1 }
  0x5c   :  { %1766 = vmatpush3.bf16.msra.mxu1 %v2013_v46 }
  0x5d   :  { %1705 = vmatpush1.bf16.msra.mxu0 %v2017_v48  ;;  %1767 = vmatprep.subr.bf16.mxu1 %v1925_v0 }
  0x5e   :  { %1707 = vmatprep.subr.bf16.mxu0 %v2030_v59 }
  0x60   :  { %1769 = vmatpush3.bf16.msra.mxu1 %v2037_v63 }
  0x61   :  { %1709 = vmatpush1.bf16.msra.mxu0 %v2041_v3  ;;  %1770 = vmatprep.subr.bf16.mxu1 %v1925_v0 }
  0x62   :  { %1711 = vmatprep.subr.bf16.mxu0 %v1710_v21 }
  0x63   :  { %1630 = vmatmul.mubr.f32.vlgmr.msra.gmra.mrb[0].mxu1 %v2085_v34 }
  0x64   :  { %1772 = vmatpush3.bf16.msra.mxu1 %v1771_v30  ;;  %478 = vmatmul.mubr.f32.vlgmr.msra.gmra.mrb[0].mxu0 %v2085_v34 }
  0x65   :  { %1713 = vmatpush1.bf16.msra.mxu0 %v1712_v23  ;;  %1773 = vmatprep.subr.bf16.mxu1 %v1925_v0 }
  0x66   :  { %1715 = vmatprep.subr.bf16.mxu0 %v1714_v18  ;;  %1644 = vmatprep.mubr.msk.f32.mxu1 %vm1926_vm0, %v1927_v1 }
  0x67   :  { %584 = vmatprep.mubr.f32.mxu0 %v1927_v1 }
  0x68   :  { %1775 = vmatpush3.bf16.msra.mxu1 %v1774_v19 }
  0x69   :  { %1717 = vmatpush1.bf16.msra.mxu0 %v1716_v20  ;;  %1776 = vmatprep.subr.bf16.mxu1 %v1925_v0 }
  0x6a   :  { %1719 = vmatprep.subr.bf16.mxu0 %v1718_v25  ;;  %v1933_v25 = vmov 1326507024  }
  0x6c   :  { %1778 = vmatpush3.bf16.msra.mxu1 %v1777_v29 }
  0x6d   :  { %1721 = vmatpush1.bf16.msra.mxu0 %v1720_v41  ;;  %1779 = vmatprep.subr.bf16.mxu1 %v1925_v0 }
  0x6e   :  { %1723 = vmatprep.subr.bf16.mxu0 %v1983_v17  ;;  %v62_v17 = vlaneseq }
  0x6f   :  { %1645 = vmatmul.mubr.f32.vlgmr.msra.gmra.mrb[0].mxu1 %v2057_v9 }
  0x70   :  { %1781 = vmatpush3.bf16.msra.mxu1 %v1991_v24  ;;  %586 = vmatmul.mubr.f32.vlgmr.msra.gmra.mrb[0].mxu0 %v2057_v9  ;;  %v63_v24 = vshrl.u32 %v62_v17, 7 }
  0x71   :  { %1725 = vmatpush1.bf16.msra.mxu0 %v1995_v26  ;;  %1782 = vmatprep.subr.bf16.mxu1 %v1925_v0 }
  0x72   :  { %1727 = vmatprep.subr.bf16.mxu0 %v2005_v39  ;;  %1659 = vmatprep.mubr.msk.f32.mxu1 %vm1926_vm0, %v1927_v1  ;;  %v72_v26 = vsub.s32 2, %v63_v24  ;;  %v64_v39 = vsub.s32 0, %v63_v24  ;;  %v68_v42 = vsub.s32 1, %v63_v24 }
  0x73   :  { %668 = vmatprep.mubr.f32.mxu0 %v1927_v1  ;;  %v60_v1 = vld [vmem:[%s2451_s1] sm:$0x7]  ;;  %s1934_s1 = smov [#allocation7]  }
  0x74   :  { %1784 = vmatpush3.bf16.msra.mxu1 %v2013_v46  ;;  %v65_v46 = vrot.slane %v60_v1, %v64_v39  ;;  %v69_v47 = vrot.slane %v60_v1, %v68_v42  ;;  %s1508_s11 = sshll.u32 %s1934_s1, 4  ;;  %s1509_s11 = int_to_ptr.vmem [resolvable:$true] %s1508_s11 }
  0x75   :  { %1729 = vmatpush1.bf16.msra.mxu0 %v2017_v48  ;;  %1785 = vmatprep.subr.bf16.mxu1 %v1925_v0  ;;  %v73_v0 = vrot.slane %v60_v1, %v72_v26  ;;  %s1893_s12 = scalar_lea.vmem %s1509_s11, 384  ;;  %p1898_p3 = scmp.lt.s32.totalorder %s1509_s11, %s1509_s11 }
  0x76   :  { %1731 = vmatprep.subr.bf16.mxu0 %v2030_v59  ;;  %p1894_p2 = scmp.ne.s32.totalorder %s1509_s11, %s1893_s12  ;;  %p1899_p4 = scmp.lt.s32.totalorder %s1893_s12, %s1893_s12 }
  0x78   :  { %1787 = vmatpush3.bf16.msra.mxu1 %v2037_v63  ;;  %p1900_p5 = por %p1899_p4, %p1898_p3 }
  0x79   :  { %1733 = vmatpush1.bf16.msra.mxu0 %v2041_v3 }
  0x7a   :  { %p1901_p6 = pnand %p1900_p5, %p1894_p2 }
  0x7b   :  { %1660 = vmatmul.mubr.f32.vlgmr.msra.gmra.mrb[0].mxu1 %v2057_v9 }
  0x7c   :  { %670 = vmatmul.mubr.f32.vlgmr.msra.gmra.mrb[0].mxu0 %v2057_v9 }
 0x14e   :  { %v1183_v48 = vpop.f32.mrb[0].mxu1 }
 0x14f   :  { %v2246_v49 = vadd.f32 %v1183_v48, %v73_v0  ;;  %v671_v50 = vpop.f32.mrb[0].mxu0  ;;  %v1661_v52 = vpop.f32.mrb[1].mxu1 }
 0x150   :  { %v2248_v57 = vadd.f32 %v671_v50, %v65_v46  ;;  %v673_v59 = vpop.f32.mrb[1].mxu0 }
 0x151   :  { %v1395_v60 = vand.u32 2147483647, %v2246_v49  ;;  %v1398_v61 = vand.u32 2139095040, %v2246_v49  ;;  %v2252_v62 = vadd.f32 %v673_v59, %v69_v47 }
 0x152   :  { %v1187_v63 = vand.u32 2147483647, %v2248_v57  ;;  %v1190_v2 = vand.u32 2139095040, %v2248_v57 }
 0x153   :  { %v1399_v3 = vshrl.u32 %v1398_v61, 23  ;;  %v1402_v4 = vand.u32 8388607, %v1395_v60  ;;  %v1294_v10 = vand.u32 2139095040, %v2252_v62  ;;  %v1291_v28 = vand.u32 2147483647, %v2252_v62 }
 0x154   :  { %v1191_v5 = vshrl.u32 %v1190_v2, 23  ;;  %v1194_v9 = vand.u32 8388607, %v1187_v63 }
 0x155   :  { %v1526_v11 = vadd.s32 4294967169, %v1399_v3  ;;  %v1295_v15 = vshrl.u32 %v1294_v10, 23  ;;  %v1403_v33 = vor.u32 8388608, %v1402_v4 }
 0x156   :  { %v1518_v12 = vadd.s32 4294967169, %v1191_v5  ;;  %v1195_v34 = vor.u32 8388608, %v1194_v9 }
 0x157   :  { %v1405_v16 = vadd.s32 1, %v1526_v11  ;;  %v1522_v54 = vadd.s32 4294967169, %v1295_v15  ;;  %v2261_v37 = vshll.u32 %v1403_v33, 8 }
 0x158   :  { %v1197_v45 = vadd.s32 1, %v1518_v12  ;;  %v2263_v53 = vshll.u32 %v1195_v34, 8 }
 0x159   :  { %vm1406_vm2 = vcmp.gt.s32.totalorder %v1405_v16, 0  ;;  %v2266_v32 = vadd.s32 1, %v1522_v54 }
 0x15a   :  { %v1407_v55 = vsel %vm1406_vm2, %v1405_v16, 0  ;;  %vm1198_vm3 = vcmp.gt.s32.totalorder %v1197_v45, 0 }
 0x15b   :  { %v1408_v7 = vshrl.u32 %v1407_v55, 5  ;;  %v1409_v22 = vand.u32 31, %v1407_v55  ;;  %v1199_v31 = vsel %vm1198_vm3, %v1197_v45, 0  ;;  %vm1302_vm8 = vcmp.gt.s32.totalorder %v2266_v32, 0 }
 0x15c   :  { %v2269_v43 = vshrl.u32 %v1199_v31, 5  ;;  %v1201_v8 = vand.u32 31, %v1199_v31 }
 0x15d   :  { %v1410_v35 = vsub.s32 32, %v1409_v22  ;;  %v1412_v38 = vshll.u32 %v1928_v36, %v1409_v22  ;;  %v1415_v6 = vshll.u32 %v1929_v58, %v1409_v22  ;;  %v1418_v44 = vshll.u32 %v1930_v56, %v1409_v22 }
 0x15e   :  { %v1421_v13 = vshll.u32 %v1931_v51, %v1409_v22  ;;  %v1424_v21 = vshll.u32 %v1932_v14, %v1409_v22  ;;  %vm1427_vm4 = vcmp.lt.s32.totalorder %v1408_v7, 1  ;;  %vm1428_vm5 = vcmp.lt.s32.totalorder %v1408_v7, 2 }
 0x15f   :  { %v1413_v30 = vshrl.u32 %v1929_v58, %v1410_v35  ;;  %v1416_v23 = vshrl.u32 %v1930_v56, %v1410_v35  ;;  %v1419_v18 = vshrl.u32 %v1931_v51, %v1410_v35  ;;  %v1411_v19 = vshrl.u32 %v1928_v36, %v1410_v35 }
 0x160   :  { %v1422_v20 = vshrl.u32 %v1932_v14, %v1410_v35  ;;  %v1425_v27 = vshrl.u32 %v1933_v25, %v1410_v35  ;;  %v1202_v17 = vsub.s32 32, %v1201_v8  ;;  %vm1429_vm6 = vcmp.lt.s32.totalorder %v1408_v7, 3 }
 0x161   :  { %v1414_v29 = vor.u32 %v1413_v30, %v1412_v38  ;;  %v1417_v40 = vor.u32 %v1416_v23, %v1415_v6  ;;  %v1420_v41 = vor.u32 %v1419_v18, %v1418_v44  ;;  %vm1430_vm7 = vcmp.lt.s32.totalorder %v1408_v7, 4 }
 0x162   :  { %v1423_v24 = vor.u32 %v1422_v20, %v1421_v13  ;;  %v1426_v26 = vor.u32 %v1425_v27, %v1424_v21  ;;  %v1204_v50 = vshll.u32 %v1928_v36, %v1201_v8  ;;  %v1205_v61 = vshrl.u32 %v1929_v58, %v1202_v17 }
 0x163   :  { %v1431_v1 = vsel %vm1427_vm4, %v1411_v19, %v1414_v29  ;;  %v1432_v39 = vsel %vm1430_vm7, %v1420_v41, 2102212464  ;;  %v1435_v42 = vsel %vm1427_vm4, %v1414_v29, %v1417_v40  ;;  %v1439_v0 = vsel %vm1427_vm4, %v1417_v40, %v1420_v41 }
 0x164   :  { %v1433_v46 = vsel %vm1429_vm6, %v1417_v40, %v1432_v39  ;;  %v1436_v47 = vsel %vm1430_vm7, %v1423_v24, 920167782  ;;  %v1440_v48 = vsel %vm1430_vm7, %v1426_v26, 1326507024  ;;  %v1207_v2 = vshll.u32 %v1929_v58, %v1201_v8 }
 0x165   :  { %v1437_v52 = vsel %vm1429_vm6, %v1420_v41, %v1436_v47  ;;  %v1441_v59 = vsel %vm1429_vm6, %v1423_v24, %v1440_v48  ;;  %v1434_v3 = vsel %vm1428_vm5, %v1431_v1, %v1433_v46  ;;  %v1208_v9 = vshrl.u32 %v1930_v56, %v1202_v17 }
 0x166   :  { %v1438_v4 = vsel %vm1428_vm5, %v1435_v42, %v1437_v52  ;;  %v1442_v5 = vsel %vm1428_vm5, %v1439_v0, %v1441_v59  ;;  %v1206_v16 = vor.u32 %v1205_v61, %v1204_v50  ;;  %v1210_v34 = vshll.u32 %v1930_v56, %v1201_v8 }
 0x167   :  { %v2293_v10 = vmul.u32.u64.low %v2261_v37, %v1442_v5  ;;  %v2294_v11 = vmul.u32.u64.high %v2261_v37, %v1442_v5, %v2293_v10  ;;  %v2297_v12 = vmul.u32.u64.low %v2261_v37, %v1438_v4  ;;  %v2298_v15 = vmul.u32.u64.high %v2261_v37, %v1438_v4, %v2297_v12 }
 0x168   :  { %v1209_v33 = vor.u32 %v1208_v9, %v1207_v2  ;;  %v1211_v45 = vshrl.u32 %v1931_v51, %v1202_v17  ;;  %v1203_v54 = vshrl.u32 %v1928_v36, %v1202_v17  ;;  %v1213_v55 = vshll.u32 %v1931_v51, %v1201_v8 }
 0x169   :  { %v1214_v7 = vshrl.u32 %v1932_v14, %v1202_v17  ;;  %v1217_v22 = vshrl.u32 %v1933_v25, %v1202_v17  ;;  %v1450_v31 = vmul.u32 %v2261_v37, %v1434_v3  ;;  %v1216_v38 = vshll.u32 %v1932_v14, %v1201_v8 }
 0x16a   :  { %v1212_v35 = vor.u32 %v1211_v45, %v1210_v34  ;;  %vm1219_vm9 = vcmp.lt.s32.totalorder %v2269_v43, 1  ;;  %vm1452_vm10 = vc.u32 %v2294_v11, %v2297_v12  ;;  %v1453_v6 = vadd.s32 1, %v2298_v15 }
 0x16b   :  { %v1215_v44 = vor.u32 %v1214_v7, %v1213_v55  ;;  %vm1220_vm11 = vcmp.lt.s32.totalorder %v2269_v43, 2  ;;  %v1218_v13 = vor.u32 %v1217_v22, %v1216_v38  ;;  %vm1221_vm12 = vcmp.lt.s32.totalorder %v2269_v43, 3 }
 0x16c   :  { %vm1222_vm13 = vcmp.lt.s32.totalorder %v2269_v43, 4  ;;  %v1227_v21 = vsel %vm1219_vm9, %v1206_v16, %v1209_v33  ;;  %v1454_v37 = vsel %vm1452_vm10, %v1453_v6, %v2298_v15  ;;  %v1231_v23 = vsel %vm1219_vm9, %v1209_v33, %v1212_v35 }
 0x16d   :  { %v1224_v30 = vsel %vm1222_vm13, %v1212_v35, 2102212464  ;;  %v1228_v8 = vsel %vm1222_vm13, %v1215_v44, 920167782  ;;  %v1455_v18 = vadd.s32 %v1454_v37, %v1450_v31  ;;  %v1223_v19 = vsel %vm1219_vm9, %v1203_v54, %v1206_v16 }
 0x16e   :  { %v1229_v20 = vsel %vm1221_vm12, %v1212_v35, %v1228_v8  ;;  %v1232_v27 = vsel %vm1222_vm13, %v1218_v13, 1326507024  ;;  %v1225_v29 = vsel %vm1221_vm12, %v1209_v33, %v1224_v30  ;;  %v1303_v17 = vsel %vm1302_vm8, %v2266_v32, 0 }
 0x16f   :  { %v1230_v40 = vsel %vm1220_vm11, %v1227_v21, %v1229_v20  ;;  %v1233_v41 = vsel %vm1221_vm12, %v1215_v44, %v1232_v27  ;;  %v1456_v24 = vadd.s32 536870912, %v1455_v18  ;;  %v1298_v46 = vand.u32 8388607, %v1291_v28 }
 0x170   :  { %v1234_v26 = vsel %vm1220_vm11, %v1231_v23, %v1233_v41  ;;  %v2325_v1 = vmul.u32.u64.low %v2263_v53, %v1230_v40  ;;  %v2326_v39 = vmul.u32.u64.high %v2263_v53, %v1230_v40, %v2325_v1  ;;  %v2335_v47 = vshrl.u32 %v1303_v17, 5 }
 0x171   :  { %v2330_v42 = vmul.u32.u64.low %v2263_v53, %v1234_v26  ;;  %v2331_v0 = vmul.u32.u64.high %v2263_v53, %v1234_v26, %v2330_v42  ;;  %v2337_v48 = vshrl.u32 %v1456_v24, 30  ;;  %v1226_v32 = vsel %vm1220_vm11, %v1223_v19, %v1225_v29 }
 0x172   :  { %v1305_v50 = vand.u32 31, %v1303_v17  ;;  %v1245_v59 = vadd.s32 1, %v2326_v39  ;;  %v1242_v2 = vmul.u32 %v2263_v53, %v1226_v32  ;;  %v1299_v3 = vor.u32 8388608, %v1298_v46 }
 0x173   :  { %v1458_v52 = vshll.u32 %v2337_v48, 30  ;;  %vm1244_vm14 = vc.u32 %v2331_v0, %v2325_v1  ;;  %vm1323_vm15 = vcmp.lt.s32.totalorder %v2335_v47, 1  ;;  %vm1325_vm0 = vcmp.lt.s32.totalorder %v2335_v47, 3 }
 0x174   :  { %v1306_v61 = vsub.s32 32, %v1305_v50  ;;  %v1246_v5 = vsel %vm1244_vm14, %v1245_v59, %v2326_v39  ;;  %v1308_v43 = vshll.u32 %v1928_v36, %v1305_v50  ;;  %v1311_v9 = vshll.u32 %v1929_v58, %v1305_v50 }
 0x175   :  { %v1459_v4 = vsub.s32 %v1455_v18, %v1458_v52  ;;  %v1247_v10 = vadd.s32 %v1246_v5, %v1242_v2  ;;  %v1314_v53 = vshll.u32 %v1930_v56, %v1305_v50  ;;  %v1317_v45 = vshll.u32 %v1931_v51, %v1305_v50 }
 0x176   :  { %v1309_v15 = vshrl.u32 %v1929_v58, %v1306_v61  ;;  %v1312_v16 = vshrl.u32 %v1930_v56, %v1306_v61  ;;  %v1315_v34 = vshrl.u32 %v1931_v51, %v1306_v61  ;;  %v1318_v54 = vshrl.u32 %v1932_v14, %v1306_v61 }
 0x177   :  { %v1461_v33 = vsub.s32 0, %v1459_v4  ;;  %v1248_v55 = vadd.s32 536870912, %v1247_v10  ;;  %v1320_v31 = vshll.u32 %v1932_v14, %v1305_v50  ;;  %v1321_v58 = vshrl.u32 %v1933_v25, %v1306_v61 }
 0x178   :  { %v1310_v7 = vor.u32 %v1309_v15, %v1308_v43  ;;  %v1313_v22 = vor.u32 %v1312_v16, %v1311_v9  ;;  %v1316_v38 = vor.u32 %v1315_v34, %v1314_v53  ;;  %v1319_v6 = vor.u32 %v1318_v54, %v1317_v45 }
 0x179   :  { %v1527_v35 = vmin.u32 %v1461_v33, %v1459_v4  ;;  %v2358_v44 = vshrl.u32 %v1248_v55, 30  ;;  %vm1326_vm1 = vcmp.lt.s32.totalorder %v2335_v47, 4  ;;  %v1322_v13 = vor.u32 %v1321_v58, %v1320_v31 }
 0x17a   :  { %v1331_v56 = vsel %vm1323_vm15, %v1310_v7, %v1313_v22  ;;  %v1328_v21 = vsel %vm1326_vm1, %v1316_v38, 2102212464  ;;  %v1332_v14 = vsel %vm1326_vm1, %v1319_v6, 920167782  ;;  %v1307_v25 = vshrl.u32 %v1928_v36, %v1306_v61 }
 0x17b   :  { %v1463_v51 = vclz %v1527_v35  ;;  %v1250_v37 = vshll.u32 %v2358_v44, 30  ;;  %vm1324_vm2 = vcmp.lt.s32.totalorder %v2335_v47, 2  ;;  %v1333_v30 = vsel %vm1325_vm0, %v1316_v38, %v1332_v14 }
 0x17c   :  { %v1334_v23 = vsel %vm1324_vm2, %v1331_v56, %v1333_v30  ;;  %v1335_v18 = vsel %vm1323_vm15, %v1313_v22, %v1316_v38  ;;  %v1339_v19 = vshll.u32 %v1299_v3, 8  ;;  %v1327_v27 = vsel %vm1323_vm15, %v1307_v25, %v1310_v7 }
 0x17d   :  { %v1528_v8 = vadd.s32 4294967294, %v1463_v51  ;;  %v1251_v20 = vsub.s32 %v1247_v10, %v1250_v37  ;;  %v1329_v36 = vsel %vm1325_vm0, %v1313_v22, %v1328_v21  ;;  %v1336_v29 = vsel %vm1326_vm1, %v1322_v13, 1326507024 }
 0x17e   :  { %v1337_v40 = vsel %vm1325_vm0, %v1319_v6, %v1336_v29  ;;  %v2385_v41 = vmul.u32.u64.low %v1339_v19, %v1334_v23  ;;  %v2386_v17 = vmul.u32.u64.high %v1339_v19, %v1334_v23, %v2385_v41  ;;  %v1451_v42 = vadd.s32 %v2297_v12, %v2294_v11 }
 0x17f   :  { %vm1529_vm3 = vcmp.lt.s32.totalorder %v1528_v8, 0  ;;  %v1253_v26 = vsub.s32 0, %v1251_v20  ;;  %v1338_v39 = vsel %vm1324_vm2, %v1335_v18, %v1337_v40  ;;  %v1330_v52 = vsel %vm1324_vm2, %v1327_v27, %v1329_v36 }
 0x180   :  { %v1466_v24 = vsel %vm1529_vm3, 0, %v1528_v8  ;;  %v2395_v59 = vmul.u32.u64.low %v1339_v19, %v1338_v39  ;;  %v2396_v61 = vmul.u32.u64.high %v1339_v19, %v1338_v39, %v2395_v59  ;;  %v1349_v43 = vadd.s32 1, %v2386_v17 }
 0x181   :  { %v1467_v46 = vsub.s32 32, %v1466_v24  ;;  %v1471_v32 = vsub.s32 4294967266, %v1466_v24  ;;  %v1519_v50 = vmin.u32 %v1253_v26, %v1251_v20  ;;  %v1468_v2 = vshll.u32 %v1459_v4, %v1466_v24 }
 0x182   :  { %v1346_v53 = vmul.u32 %v1339_v19, %v1330_v52  ;;  %vm1348_vm4 = vc.u32 %v2396_v61, %v2385_v41  ;;  %v1481_v4 = vsub.s32 4, %v2337_v48  ;;  %v1243_v54 = vadd.s32 %v2325_v1, %v2331_v0 }
 0x183   :  { %v1469_v3 = vshrl.u32 %v1451_v42, %v1467_v46  ;;  %v1472_v5 = vadd.s32 127, %v1471_v32  ;;  %v1255_v9 = vclz %v1519_v50  ;;  %v1350_v12 = vsel %vm1348_vm4, %v1349_v43, %v2386_v17 }
 0x184   :  { %v1351_v47 = vadd.s32 %v1350_v12, %v1346_v53  ;;  %vm1397_vm6 = vcmp.lt.s32.totalorder %v2246_v49, 0  ;;  %vm1396_vm7 = vcmp.le.f32.partialorder %v1395_v60, 0.7853982  ;;  %vm1189_vm8 = vcmp.lt.s32.totalorder %v2248_v57, 0 }
 0x185   :  { %v1470_v10 = vor.u32 %v1469_v3, %v1468_v2  ;;  %v1473_v15 = vshll.u32 %v1472_v5, 23  ;;  %v1520_v16 = vadd.s32 4294967294, %v1255_v9  ;;  %v1482_v51 = vsel %vm1397_vm6, %v1481_v4, %v2337_v48 }
 0x186   :  { %v1352_v22 = vadd.s32 536870912, %v1351_v47  ;;  %v1484_v30 = vsel %vm1396_vm7, 0, %v1482_v51  ;;  %v1273_v48 = vsub.s32 4, %v2358_v44  ;;  %vm2418_vm9 = vcmp.le.f32.partialorder %v1187_v63, 0.7853982 }
 0x187   :  { %v1474_v11 = vor.u32 4788187, %v1473_v15  ;;  %vm1521_vm5 = vcmp.lt.s32.totalorder %v1520_v16, 0  ;;  %v1477_v34 = vcvt.s32.f32 %v1470_v10  ;;  %v1488_v27 = vadd.s32 3, %v1484_v30 }
 0x188   :  { %v1258_v45 = vsel %vm1521_vm5, 0, %v1520_v16  ;;  %v2405_v58 = vshrl.u32 %v1352_v22, 30  ;;  %v1274_v29 = vsel %vm1189_vm8, %v1273_v48, %v2358_v44  ;;  %v1347_v63 = vadd.s32 %v2385_v41, %v2396_v61 }
 0x189   :  { %v1475_v33 = vand.u32 2147483647, %v1474_v11  ;;  %v1259_v55 = vsub.s32 32, %v1258_v45  ;;  %v1263_v7 = vsub.s32 4294967266, %v1258_v45  ;;  %v1260_v35 = vshll.u32 %v1251_v20, %v1258_v45 }
 0x18a   :  { %v1354_v14 = vshll.u32 %v2405_v58, 30  ;;  %v1489_v39 = vand.u32 3, %v1488_v27  ;;  %v1276_v42 = vsel %vm2418_vm9, 0, %v1274_v29  ;;  %vm1487_vm14 = vweird.f32 %v2246_v49 }
 0x18b   :  { %v1478_v31 = vmul.f32 %v1477_v34, %v1475_v33  ;;  %v1261_v38 = vshrl.u32 %v1243_v54, %v1259_v55  ;;  %v1264_v6 = vadd.s32 127, %v1263_v7  ;;  %v1280_v2 = vadd.s32 3, %v1276_v42 }
 0x18c   :  { %v1355_v25 = vsub.s32 %v1351_v47, %v1354_v14  ;;  %vm1491_vm11 = vcmp.eq.s32.totalorder %v1489_v39, 0  ;;  %vm1494_vm12 = vcmp.eq.s32.totalorder %v1489_v39, 2  ;;  %vm1490_vm13 = vcmp.lt.s32.totalorder %v1489_v39, 2 }
 0x18d   :  { %v1479_v56 = vxor.u32 2147483648, %v1478_v31  ;;  %v1262_v13 = vor.u32 %v1261_v38, %v1260_v35  ;;  %v1265_v21 = vshll.u32 %v1264_v6, 23  ;;  %v1281_v61 = vand.u32 3, %v1280_v2 }
 0x18e   :  { %v1357_v18 = vsub.s32 0, %v1355_v25  ;;  %v1377_v55 = vsub.s32 4, %v2405_v58  ;;  %vm1293_vm2 = vcmp.lt.s32.totalorder %v2252_v62, 0  ;;  %vm1279_vm3 = vweird.f32 %v2248_v57 }
 0x18f   :  { %v1480_v1 = vsel %vm1397_vm6, %v1479_v56, %v1478_v31  ;;  %v1266_v37 = vor.u32 4788187, %v1265_v21  ;;  %v1269_v23 = vcvt.s32.f32 %v1262_v13  ;;  %vm1286_vm15 = vcmp.eq.s32.totalorder %v1281_v61, 2 }
 0x190   :  { %v1483_v0 = vsel %vm1396_vm7, %v2246_v49, %v1480_v1  ;;  %v1523_v20 = vmin.u32 %v1357_v18, %v1355_v25  ;;  %vm1283_vm0 = vcmp.eq.s32.totalorder %v1281_v61, 0  ;;  %vm1282_vm1 = vcmp.lt.s32.totalorder %v1281_v61, 2 }
 0x191   :  { %1837 = vcosq.f32 %v1483_v0  ;;  %v1267_v8 = vand.u32 2147483647, %v1266_v37  ;;  %vm1292_vm4 = vcmp.le.f32.partialorder %v1291_v28, 0.7853982  ;;  %v1378_v6 = vsel %vm1293_vm2, %v1377_v55, %v2405_v58 }
 0x192   :  { %1839 = vsinq.f32 %v1483_v0  ;;  %v1359_v60 = vclz %v1523_v20  ;;  %v1380_v13 = vsel %vm1292_vm4, 0, %v1378_v6 }
 0x193   :  { %v1270_v19 = vmul.f32 %v1269_v23, %v1267_v8  ;;  %v1384_v21 = vadd.s32 3, %v1380_v13 }
 0x194   :  { %v1524_v24 = vadd.s32 4294967294, %v1359_v60 }
 0x195   :  { %v1271_v36 = vxor.u32 2147483648, %v1270_v19  ;;  %v1385_v14 = vand.u32 3, %v1384_v21 }
 0x196   :  { %vm1525_vm10 = vcmp.lt.s32.totalorder %v1524_v24, 0 }
 0x197   :  { %v1272_v17 = vsel %vm1189_vm8, %v1271_v36, %v1270_v19  ;;  %v1362_v44 = vsel %vm1525_vm10, 0, %v1524_v24  ;;  %vm1390_vm5 = vcmp.eq.s32.totalorder %v1385_v14, 2  ;;  %vm1387_vm6 = vcmp.eq.s32.totalorder %v1385_v14, 0 }
 0x198   :  { %v1275_v26 = vsel %vm2418_vm9, %v2248_v57, %v1272_v17  ;;  %v1363_v50 = vsub.s32 32, %v1362_v44  ;;  %v1367_v52 = vsub.s32 4294967266, %v1362_v44  ;;  %v1364_v5 = vshll.u32 %v1355_v25, %v1362_v44 }
 0x199   :  { %1841 = vcosq.f32 %v1275_v26  ;;  %vm1386_vm7 = vcmp.lt.s32.totalorder %v1385_v14, 2  ;;  %vm1383_vm8 = vweird.f32 %v2252_v62 }
 0x19a   :  { %1843 = vsinq.f32 %v1275_v26  ;;  %v1365_v43 = vshrl.u32 %v1347_v63, %v1363_v50  ;;  %v1368_v9 = vadd.s32 127, %v1367_v52 }
 0x19b   :  { %v1838_v46 = vpop.eup %1837 }
 0x19c   :  { %v1840_v32 = vpop.eup %1839  ;;  %v1495_v59 = vxor.u32 2147483648, %v1838_v46  ;;  %v1366_v16 = vor.u32 %v1365_v43, %v1364_v5  ;;  %v1369_v53 = vshll.u32 %v1368_v9, 23 }
 0x19d   :  { %v1492_v3 = vxor.u32 2147483648, %v1840_v32 }
 0x19e   :  { %v1496_v10 = vsel %vm1494_vm12, %v1495_v59, %v1840_v32  ;;  %v1370_v41 = vor.u32 4788187, %v1369_v53  ;;  %v1373_v34 = vcvt.s32.f32 %v1366_v16 }
 0x19f   :  { %v1493_v15 = vsel %vm1491_vm11, %v1838_v46, %v1492_v3 }
 0x1a0   :  { %v1497_v11 = vsel %vm1490_vm13, %v1493_v15, %v1496_v10  ;;  %v1371_v33 = vand.u32 2147483647, %v1370_v41 }
 0x1a1   :  { %v1498_v12 = vsel %vm1487_vm14, nan, %v1497_v11 }
 0x1a2   :  { %1501 = vst [vmem:[#allocation7 + $0x10] sm:$0xff] %v1498_v12  ;;  %v1374_v54 = vmul.f32 %v1373_v34, %v1371_v33 }
 0x1a3   :  { %v1842_v47 = vpop.eup %1841 }
 0x1a4   :  { %v1844_v4 = vpop.eup %1843  ;;  %v1287_v45 = vxor.u32 2147483648, %v1842_v47  ;;  %v1375_v31 = vxor.u32 2147483648, %v1374_v54 }
 0x1a5   :  { %v1284_v7 = vxor.u32 2147483648, %v1844_v4 }
 0x1a6   :  { %v1288_v22 = vsel %vm1286_vm15, %v1287_v45, %v1844_v4  ;;  %v1376_v38 = vsel %vm1293_vm2, %v1375_v31, %v1374_v54 }
 0x1a7   :  { %v1285_v49 = vsel %vm1283_vm0, %v1842_v47, %v1284_v7  ;;  %v1379_v51 = vsel %vm1292_vm4, %v2252_v62, %v1376_v38 }
 0x1a8   :  { %v1289_v35 = vsel %vm1282_vm1, %v1285_v49, %v1288_v22  ;;  %1845 = vcosq.f32 %v1379_v51 }
 0x1a9   :  { %v1290_v56 = vsel %vm1279_vm3, nan, %v1289_v35  ;;  %1847 = vsinq.f32 %v1379_v51 }
 0x1aa   :  { %1499 = vst [vmem:[#allocation7] sm:$0xff] %v1290_v56 }
 0x1b2   :  { %v1846_v1 = vpop.eup %1845 }
 0x1b3   :  { %v1848_v0 = vpop.eup %1847  ;;  %v1391_v37 = vxor.u32 2147483648, %v1846_v1 }
 0x1b4   :  { %v1388_v57 = vxor.u32 2147483648, %v1848_v0 }
 0x1b5   :  { %v1392_v28 = vsel %vm1390_vm5, %v1391_v37, %v1848_v0 }
 0x1b6   :  { %v1389_v58 = vsel %vm1387_vm6, %v1846_v1, %v1388_v57 }
 0x1b7   :  { %v1393_v25 = vsel %vm1386_vm7, %v1389_v58, %v1392_v28 }
 0x1b8   :  { %v1394_v30 = vsel %vm1383_vm8, nan, %v1393_v25 }
 0x1b9   :  { %1500 = vst [vmem:[#allocation7 + $0x8] sm:$0xff] %v1394_v30 }
 0x1ba   :  { %1904 = shalt.err (!%p1901_p6)
}
 0x1bb   :  { %s1905_s15 = scalar_lea.hbm %s2453_s3, 384 }
 0x1bc   :  { %p1906_p7 = scmp.ne.s32.totalorder %s2453_s3, %s1905_s15  ;;  %p1909_p8 = scmp.lt.u32.totalorder %s1905_s15, %s2453_s3 }
 0x1be   :  { %p1911_p9 = pnand %p1909_p8, %p1906_p7 }
 0x1c0   :  { %1914 = shalt.err (!%p1911_p9)
}
 0x1c1   :  { %1511 = dma.vmem_to_hbm [thread:$0]  %s1509_s11, 384, %s2453_s3, [#allocation4]  }
 0x1c2   :  { %1919 = dma.done.wait [#allocation4], 384  }
 0x1c3   :  { %1920 = vsyncadd [#allocation4], 4294966912 }
 0x1c4   :  { %1515 = vsyncpa [#allocation3], 1 }
 0x1c5   :  { %1516 = vsyncpa [#allocation6], 1 }
 0x1c6   :  { %1517 = vsyncpa [#allocation4], 1 }

</bundles_post_ra>
